<compile_context>
chip_gen: v6e
topology: v6e:2x2x1
jax: 0.10.0
libtpu: 0.0.40
codegen_flags: <defaults>
</compile_context>

<pallas_src>
import math
from functools import partial

import jax
import jax.numpy as jnp
import numpy as np
from jax.experimental import pallas as pl
from jax.experimental.pallas import tpu as pltpu

# ------------------------- model dimensions (small) -------------------------
BATCH = 4
SNP_DIM = 128          # snp_input_dim      (scaled down from 450)
CLI_DIM = 32           # clinical_input_dim (scaled down from 42)
MRI_DIM = 256          # mri_feature_dim    (scaled down from 2048)
FUSION = 64            # fusion_dim
SNP_HIDDEN = [128, 128, FUSION]   # SDAE encoder hidden dims (last == fusion_dim)
NUM_CLASSES = 2
BN_EPS = 1e-5
BN_SCALE = 1.0 / math.sqrt(1.0 + BN_EPS)   # eval-mode BN (mean=0, var=1, g=1, b=0)

# ------------------------- packed-weight geometry ----------------------------
WIDE_LANES = 256       # stages whose (padded) output needs two lane tiles
NARROW_LANES = 128     # stages whose (padded) output fits one lane tile
OUT_LANES = 128        # lane-dense logits output (sliced to NUM_CLASSES outside)
N_BIAS_ROWS = 8

# wide bands: S0-mri, S0-snp, S0-cli, S1, S2, S3  (contraction dim per band)
WIDE_K = (MRI_DIM, SNP_DIM, CLI_DIM, 256, 256, 256)
WIDE_OFFS = tuple(int(x) for x in np.cumsum((0,) + WIDE_K[:-1]))
WIDE_ROWS = int(sum(WIDE_K))                 # 1184 (multiple of 8)

# narrow bands: S4 (attention scores), S5 (classifier hidden), S6 (logits)
NARROW_K = (256, FUSION, 128)
NARROW_OFFS = tuple(int(x) for x in np.cumsum((0,) + NARROW_K[:-1]))
NARROW_ROWS = int(sum(NARROW_K))             # 448 (multiple of 8)

# Activation lane layouts (all zero-padded up to the blob width):
#   h1  [B,256] = [mri'(0:64) | s1(64:192) | c1(192:256)]
#   h2  [B,256] = [mri'(0:64) | s2(64:192) | c2(192:224) | 0]
#   att [B,256] = [mri'(0:64) | s3(64:128) | c2(128:160) | 0]
#   p   [B,256] = [pm(0:64)   | ps(64:128) | pc(128:192) | 0]
#   sc  [B,128] = [3 scores | 0],  h [B,128] = [32 hidden | 0],
#   out [B,128] = [2 logits | 0]


# ------------------------------- Pallas kernel ------------------------------
def hamf_kernel(mri_ref, snp_ref, cli_ref, ww_ref, wn_ref, b_ref, out_ref):
    f32, bf16 = jnp.float32, jnp.bfloat16
    relu = lambda t: jnp.maximum(t, 0.0)

    def wdot(x, band):                      # dot against a wide (256-lane) band
        r, k = WIDE_OFFS[band], WIDE_K[band]
        return jnp.dot(x.astype(bf16), ww_ref[r:r + k, :],
                       preferred_element_type=f32)

    def ndot(x, band):                      # dot against a narrow (128-lane) band
        r, k = NARROW_OFFS[band], NARROW_K[band]
        return jnp.dot(x.astype(bf16), wn_ref[r:r + k, :],
                       preferred_element_type=f32)

    # S0: MRI projection (BN folded) + SNP L1 + Clinical L1 — three row bands, one sum
    h1 = relu(wdot(mri_ref[...], 0) + wdot(snp_ref[...], 1)
              + wdot(cli_ref[...], 2) + b_ref[0:1, :])          # [B,256]
    # S1: SNP L2 + Clinical L2, mri' carried by a 64x64 identity block
    h2 = relu(wdot(h1, 3) + b_ref[1:2, :])                      # [B,256]
    # S2: SNP L3; mri' and c2 carried by identity blocks -> att = [mri'|s3|c2|0]
    att = relu(wdot(h2, 4) + b_ref[2:3, :])                     # [B,256]
    # S3: hierarchical-attention projections (tanh), block-diag over 3 modalities
    p = jnp.tanh(wdot(att, 5) + b_ref[3:4, :])                  # [B,256] = [pm|ps|pc|0]

    # S4: modality scores via block-diag scoring vector (c_att folded into bias)
    sc = ndot(p, 0) + b_ref[4:5, 0:NARROW_LANES]                # [B,128], lanes 0:3 valid
    sc3 = sc[:, 0:3]
    m = jnp.max(sc3, axis=-1, keepdims=True)
    e = jnp.exp(sc3 - m)
    inv = pl.reciprocal(jnp.sum(e, axis=-1, keepdims=True), approx=True)
    alpha = e * inv                                             # [B,3] softmax weights

    fused = (alpha[:, 0:1] * p[:, 0:FUSION]
             + alpha[:, 1:2] * p[:, FUSION:2 * FUSION]
             + alpha[:, 2:3] * p[:, 2 * FUSION:3 * FUSION])     # [B,64]

    # S5/S6: classifier (BN folded into first layer)
    h = relu(ndot(fused, 1) + b_ref[5:6, 0:NARROW_LANES])       # [B,128], lanes 0:32 valid
    out_ref[...] = (ndot(h, 2) + b_ref[6:7, 0:NARROW_LANES]).astype(out_ref.dtype)


# ------------------------------ parameter init -------------------------------
def xavier_normal(key, fan_in, fan_out):
    std = np.sqrt(2.0 / (fan_in + fan_out))
    # stored [in, out] (pre-transposed vs. PyTorch's [out, in])
    return jax.random.normal(key, (fan_in, fan_out), dtype=jnp.float32) * std


def init_params(key):
    ks = jax.random.split(key, 16)
    z = lambda d: jnp.zeros((1, d), jnp.float32)
    p = {}
    # MRI projection
    p["w_mp"], p["b_mp"] = xavier_normal(ks[0], MRI_DIM, FUSION), z(FUSION)
    # SNP SDAE encoder
    p["w_s1"], p["b_s1"] = xavier_normal(ks[1], SNP_DIM, SNP_HIDDEN[0]), z(SNP_HIDDEN[0])
    p["w_s2"], p["b_s2"] = xavier_normal(ks[2], SNP_HIDDEN[0], SNP_HIDDEN[1]), z(SNP_HIDDEN[1])
    p["w_s3"], p["b_s3"] = xavier_normal(ks[3], SNP_HIDDEN[1], SNP_HIDDEN[2]), z(SNP_HIDDEN[2])
    # Clinical DNN
    p["w_c1"], p["b_c1"] = xavier_normal(ks[4], CLI_DIM, FUSION), z(FUSION)
    p["w_c2"], p["b_c2"] = xavier_normal(ks[5], FUSION, FUSION // 2), z(FUSION // 2)
    # Hierarchical attention (per-modality projection + shared scoring vector)
    p["w_am"], p["b_am"] = xavier_normal(ks[6], FUSION, FUSION), z(FUSION)
    p["w_as"], p["b_as"] = xavier_normal(ks[7], SNP_HIDDEN[2], FUSION), z(FUSION)
    p["w_ac"], p["b_ac"] = xavier_normal(ks[8], FUSION // 2, FUSION), z(FUSION)
    p["v_att"] = xavier_normal(ks[9], FUSION, 1)
    p["c_att"] = jnp.zeros((1, 1), jnp.float32)
    # Classifier
    p["w_cl1"], p["b_cl1"] = xavier_normal(ks[10], FUSION, FUSION // 2), z(FUSION // 2)
    p["w_cl2"], p["b_cl2"] = xavier_normal(ks[11], FUSION // 2, NUM_CLASSES), z(NUM_CLASSES)
    return p


# ------------------------ host-side block-diag packing -----------------------
def pack_params(p):
    """Pack all Linears into two bf16 weight blobs + one f32 bias blob."""
    P = {k: np.asarray(v, np.float32) for k, v in p.items()}
    ww = np.zeros((WIDE_ROWS, WIDE_LANES), np.float32)
    wn = np.zeros((NARROW_ROWS, NARROW_LANES), np.float32)
    bb = np.zeros((N_BIAS_ROWS, WIDE_LANES), np.float32)
    eye = np.eye

    # ---- S0: [mri], [snp], [cli] -> h1 = [mri'|s1|c1]  (BN folded into MRI) --
    r = WIDE_OFFS[0]; ww[r:r + MRI_DIM, 0:64] = P["w_mp"] * BN_SCALE
    r = WIDE_OFFS[1]; ww[r:r + SNP_DIM, 64:192] = P["w_s1"]
    r = WIDE_OFFS[2]; ww[r:r + CLI_DIM, 192:256] = P["w_c1"]
    bb[0, 0:64] = P["b_mp"][0] * BN_SCALE
    bb[0, 64:192] = P["b_s1"][0]
    bb[0, 192:256] = P["b_c1"][0]

    # ---- S1: h1 -> h2 = [mri'|s2|c2|0]  (identity carry for mri') ------------
    r = WIDE_OFFS[3]
    ww[r:r + 64, 0:64] = eye(64, dtype=np.float32)
    ww[r + 64:r + 192, 64:192] = P["w_s2"]
    ww[r + 192:r + 256, 192:224] = P["w_c2"]
    bb[1, 64:192] = P["b_s2"][0]
    bb[1, 192:224] = P["b_c2"][0]

    # ---- S2: h2 -> att = [mri'|s3|c2|0]  (identity carries for mri', c2) -----
    r = WIDE_OFFS[4]
    ww[r:r + 64, 0:64] = eye(64, dtype=np.float32)
    ww[r + 64:r + 192, 64:128] = P["w_s3"]
    ww[r + 192:r + 224, 128:160] = eye(32, dtype=np.float32)
    bb[2, 64:128] = P["b_s3"][0]

    # ---- S3: att -> p = [pm|ps|pc|0]  (attention projections, tanh) ----------
    r = WIDE_OFFS[5]
    ww[r:r + 64, 0:64] = P["w_am"]
    ww[r + 64:r + 128, 64:128] = P["w_as"]
    ww[r + 128:r + 160, 128:192] = P["w_ac"]
    bb[3, 0:64] = P["b_am"][0]
    bb[3, 64:128] = P["b_as"][0]
    bb[3, 128:192] = P["b_ac"][0]

    # ---- S4: p -> scores  (block-diag scoring vector, c_att in bias) ---------
    r = NARROW_OFFS[0]
    v = P["v_att"][:, 0]
    wn[r + 0:r + 64, 0] = v
    wn[r + 64:r + 128, 1] = v
    wn[r + 128:r + 192, 2] = v
    bb[4, 0:3] = float(P["c_att"][0, 0])

    # ---- S5: fused -> hidden  (BN folded) ------------------------------------
    r = NARROW_OFFS[1]
    wn[r:r + 64, 0:32] = P["w_cl1"] * BN_SCALE
    bb[5, 0:32] = P["b_cl1"][0] * BN_SCALE

    # ---- S6: hidden -> logits -------------------------------------------------
    r = NARROW_OFFS[2]
    wn[r:r + 32, 0:NUM_CLASSES] = P["w_cl2"]
    bb[6, 0:NUM_CLASSES] = P["b_cl2"][0]

    return (jnp.asarray(ww, dtype=jnp.bfloat16),
            jnp.asarray(wn, dtype=jnp.bfloat16),
            jnp.asarray(bb, dtype=jnp.float32))


# ------------------------------- wrapper -------------------------------------
@partial(jax.jit, static_argnames=("batch_tile",))
def hamf_forward(mri, snp, cli, w_wide, w_narrow, bias, batch_tile=256):
    f32 = jnp.float32
    mri, snp, cli = mri.astype(f32), snp.astype(f32), cli.astype(f32)
    B = mri.shape[0]
    tb = B if B <= batch_tile else batch_tile          # one block for small B
    Bp = ((B + tb - 1) // tb) * tb
    if Bp != B:                                        # only for large, ragged B
        pad = lambda a: jnp.pad(a, ((0, Bp - B), (0, 0)))
        mri, snp, cli = pad(mri), pad(snp), pad(cli)

    row_spec = lambda d: pl.BlockSpec((tb, d), lambda i: (i, 0))
    fix_spec = lambda shape: pl.BlockSpec(shape, lambda i: (0, 0))  # stays resident

    out = pl.pallas_call(
        hamf_kernel,
        out_shape=jax.ShapeDtypeStruct((Bp, OUT_LANES), jnp.float32),
        grid_spec=pltpu.PrefetchScalarGridSpec(
            num_scalar_prefetch=0,
            grid=(Bp // tb,),
            in_specs=[row_spec(MRI_DIM), row_spec(SNP_DIM), row_spec(CLI_DIM),
                      fix_spec((WIDE_ROWS, WIDE_LANES)),
                      fix_spec((NARROW_ROWS, NARROW_LANES)),
                      fix_spec((N_BIAS_ROWS, WIDE_LANES))],
            out_specs=row_spec(OUT_LANES)),
        compiler_params=pltpu.CompilerParams(
            dimension_semantics=("parallel",)),
    )(mri, snp, cli, w_wide, w_narrow, bias)
    return out[:B, :NUM_CLASSES]


# --------------------------- numpy reference (check) -------------------------
def hamf_reference_np(mri, snp, cli, p):
    P = {k: np.asarray(v, np.float32) for k, v in p.items()}
    relu = lambda t: np.maximum(t, 0.0)
    m = relu((mri @ P["w_mp"] + P["b_mp"]) * BN_SCALE)
    s = relu(snp @ P["w_s1"] + P["b_s1"])
    s = relu(s @ P["w_s2"] + P["b_s2"])
    s = relu(s @ P["w_s3"] + P["b_s3"])
    c = relu(cli @ P["w_c1"] + P["b_c1"])
    c = relu(c @ P["w_c2"] + P["b_c2"])
    pm = np.tanh(m @ P["w_am"] + P["b_am"])
    ps = np.tanh(s @ P["w_as"] + P["b_as"])
    pc = np.tanh(c @ P["w_ac"] + P["b_ac"])
    v, cb = P["v_att"], P["c_att"][0, 0]
    sc = np.concatenate([pm @ v + cb, ps @ v + cb, pc @ v + cb], axis=-1)
    e = np.exp(sc - sc.max(axis=-1, keepdims=True))
    a = e / e.sum(axis=-1, keepdims=True)
    fused = a[:, 0:1] * pm + a[:, 1:2] * ps + a[:, 2:3] * pc
    h = relu((fused @ P["w_cl1"] + P["b_cl1"]) * BN_SCALE)
    return h @ P["w_cl2"] + P["b_cl2"]


if __name__ == "__main__":
    key = jax.random.PRNGKey(0)
    k_mri, k_snp, k_cli, k_par, k_big = jax.random.split(key, 5)

    params = init_params(k_par)
    w_wide, w_narrow, bias = pack_params(params)

    # ---- small latency-style batch (single block, grid=(1,)) ----
    mri = jax.random.normal(k_mri, (BATCH, MRI_DIM), dtype=jnp.float32)
    snp = jax.random.normal(k_snp, (BATCH, SNP_DIM), dtype=jnp.float32)
    cli = jax.random.normal(k_cli, (BATCH, CLI_DIM), dtype=jnp.float32)

    logits = hamf_forward(mri, snp, cli, w_wide, w_narrow, bias)
    jax.block_until_ready(logits)
    assert logits.shape == (BATCH, NUM_CLASSES)
    assert bool(jnp.all(jnp.isfinite(logits)))

    ref = hamf_reference_np(np.asarray(mri), np.asarray(snp), np.asarray(cli), params)
    err = float(np.max(np.abs(np.asarray(logits) - ref)))
    assert np.allclose(np.asarray(logits), ref, rtol=5e-2, atol=5e-2), err

    # ---- larger throughput-style batch exercising the parallel batch grid ----
    B2 = 512
    km2, ks2, kc2 = jax.random.split(k_big, 3)
    mri2 = jax.random.normal(km2, (B2, MRI_DIM), dtype=jnp.float32)
    snp2 = jax.random.normal(ks2, (B2, SNP_DIM), dtype=jnp.float32)
    cli2 = jax.random.normal(kc2, (B2, CLI_DIM), dtype=jnp.float32)

    logits2 = hamf_forward(mri2, snp2, cli2, w_wide, w_narrow, bias, batch_tile=256)
    jax.block_until_ready(logits2)
    assert logits2.shape == (B2, NUM_CLASSES)
    ref2 = hamf_reference_np(np.asarray(mri2), np.asarray(snp2), np.asarray(cli2), params)
    err2 = float(np.max(np.abs(np.asarray(logits2) - ref2)))
    assert np.allclose(np.asarray(logits2), ref2, rtol=5e-2, atol=5e-2), err2

    print("KERNEL_OK")
</pallas_src>

<mosaic_0001>
module attributes {stable_mosaic.version = 11 : i64} {
  func.func @hamf_kernel(%arg0: i32, %arg1: memref<4x256xf32, #tpu.memory_space<vmem>>, %arg2: memref<4x128xf32, #tpu.memory_space<vmem>>, %arg3: memref<4x32xf32, #tpu.memory_space<vmem>>, %arg4: memref<1184x256xbf16, #tpu.memory_space<vmem>>, %arg5: memref<448x128xbf16, #tpu.memory_space<vmem>>, %arg6: memref<8x256xf32, #tpu.memory_space<vmem>>, %arg7: memref<4x128xf32, #tpu.memory_space<vmem>>) attributes {dimension_semantics = [#tpu.dimension_semantics<parallel>], iteration_bounds = array<i64: 1>, scalar_prefetch = 0 : i64, scratch_operands = 0 : i64, tpu.core_type = #tpu.core_type<tc>, window_params = [{transform_indices = @transform_0, window_bounds = array<i64: 4, 256>}, {transform_indices = @transform_1, window_bounds = array<i64: 4, 128>}, {transform_indices = @transform_2, window_bounds = array<i64: 4, 32>}, {pipeline_mode = #tpu.pipeline_mode<synchronous>, transform_indices = @transform_3, window_bounds = array<i64: 1184, 256>}, {pipeline_mode = #tpu.pipeline_mode<synchronous>, transform_indices = @transform_4, window_bounds = array<i64: 448, 128>}, {pipeline_mode = #tpu.pipeline_mode<synchronous>, transform_indices = @transform_5, window_bounds = array<i64: 8, 256>}, {transform_indices = @transform_6, window_bounds = array<i64: 4, 128>}]} {
    %c0 = arith.constant 0 : index
    %c0_0 = arith.constant 0 : index
    %0 = vector.load %arg1[%c0, %c0_0] : memref<4x256xf32, #tpu.memory_space<vmem>>, vector<4x256xf32>
    %1 = arith.truncf %0 : vector<4x256xf32> to vector<4x256xbf16>
    %c0_1 = arith.constant 0 : index
    %c0_2 = arith.constant 0 : index
    %2 = vector.load %arg4[%c0_1, %c0_2] : memref<1184x256xbf16, #tpu.memory_space<vmem>>, vector<256x256xbf16>
    %cst = arith.constant dense<0.000000e+00> : vector<4x256xf32>
    %3 = tpu.matmul %1, %2, %cst {dimension_numbers = #tpu.dot_dimension_numbers<[1], [0], [0], [1], [0, 0, 1, 1], [], []>} : vector<4x256xbf16>, vector<256x256xbf16>, vector<4x256xf32> -> vector<4x256xf32>
    %c0_3 = arith.constant 0 : index
    %c0_4 = arith.constant 0 : index
    %4 = vector.load %arg2[%c0_3, %c0_4] : memref<4x128xf32, #tpu.memory_space<vmem>>, vector<4x128xf32>
    %5 = arith.truncf %4 : vector<4x128xf32> to vector<4x128xbf16>
    %c256 = arith.constant 256 : index
    %c0_5 = arith.constant 0 : index
    %6 = vector.load %arg4[%c256, %c0_5] : memref<1184x256xbf16, #tpu.memory_space<vmem>>, vector<128x256xbf16>
    %cst_6 = arith.constant dense<0.000000e+00> : vector<4x256xf32>
    %7 = tpu.matmul %5, %6, %cst_6 {dimension_numbers = #tpu.dot_dimension_numbers<[1], [0], [0], [1], [0, 0, 1, 1], [], []>} : vector<4x128xbf16>, vector<128x256xbf16>, vector<4x256xf32> -> vector<4x256xf32>
    %8 = arith.addf %3, %7 : vector<4x256xf32>
    %c0_7 = arith.constant 0 : index
    %c0_8 = arith.constant 0 : index
    %9 = vector.load %arg3[%c0_7, %c0_8] : memref<4x32xf32, #tpu.memory_space<vmem>>, vector<4x32xf32>
    %10 = arith.truncf %9 : vector<4x32xf32> to vector<4x32xbf16>
    %c384 = arith.constant 384 : index
    %c0_9 = arith.constant 0 : index
    %11 = vector.load %arg4[%c384, %c0_9] : memref<1184x256xbf16, #tpu.memory_space<vmem>>, vector<32x256xbf16>
    %cst_10 = arith.constant dense<0.000000e+00> : vector<4x256xf32>
    %12 = tpu.matmul %10, %11, %cst_10 {dimension_numbers = #tpu.dot_dimension_numbers<[1], [0], [0], [1], [0, 0, 1, 1], [], []>} : vector<4x32xbf16>, vector<32x256xbf16>, vector<4x256xf32> -> vector<4x256xf32>
    %13 = arith.addf %8, %12 : vector<4x256xf32>
    %c0_11 = arith.constant 0 : index
    %c0_12 = arith.constant 0 : index
    %14 = vector.load %arg6[%c0_11, %c0_12] : memref<8x256xf32, #tpu.memory_space<vmem>>, vector<1x256xf32>
    %15 = vector.broadcast %14 : vector<1x256xf32> to vector<4x256xf32>
    %16 = arith.addf %13, %15 : vector<4x256xf32>
    %cst_13 = arith.constant 0.000000e+00 : f32
    %17 = vector.broadcast %cst_13 : f32 to vector<4x256xf32>
    %18 = arith.maximumf %16, %17 : vector<4x256xf32>
    %19 = arith.truncf %18 : vector<4x256xf32> to vector<4x256xbf16>
    %c416 = arith.constant 416 : index
    %c0_14 = arith.constant 0 : index
    %20 = vector.load %arg4[%c416, %c0_14] : memref<1184x256xbf16, #tpu.memory_space<vmem>>, vector<256x256xbf16>
    %cst_15 = arith.constant dense<0.000000e+00> : vector<4x256xf32>
    %21 = tpu.matmul %19, %20, %cst_15 {dimension_numbers = #tpu.dot_dimension_numbers<[1], [0], [0], [1], [0, 0, 1, 1], [], []>} : vector<4x256xbf16>, vector<256x256xbf16>, vector<4x256xf32> -> vector<4x256xf32>
    %c1 = arith.constant 1 : index
    %c0_16 = arith.constant 0 : index
    %22 = vector.load %arg6[%c1, %c0_16] : memref<8x256xf32, #tpu.memory_space<vmem>>, vector<1x256xf32>
    %23 = vector.broadcast %22 : vector<1x256xf32> to vector<4x256xf32>
    %24 = arith.addf %21, %23 : vector<4x256xf32>
    %cst_17 = arith.constant 0.000000e+00 : f32
    %25 = vector.broadcast %cst_17 : f32 to vector<4x256xf32>
    %26 = arith.maximumf %24, %25 : vector<4x256xf32>
    %27 = arith.truncf %26 : vector<4x256xf32> to vector<4x256xbf16>
    %c672 = arith.constant 672 : index
    %c0_18 = arith.constant 0 : index
    %28 = vector.load %arg4[%c672, %c0_18] : memref<1184x256xbf16, #tpu.memory_space<vmem>>, vector<256x256xbf16>
    %cst_19 = arith.constant dense<0.000000e+00> : vector<4x256xf32>
    %29 = tpu.matmul %27, %28, %cst_19 {dimension_numbers = #tpu.dot_dimension_numbers<[1], [0], [0], [1], [0, 0, 1, 1], [], []>} : vector<4x256xbf16>, vector<256x256xbf16>, vector<4x256xf32> -> vector<4x256xf32>
    %c2 = arith.constant 2 : index
    %c0_20 = arith.constant 0 : index
    %30 = vector.load %arg6[%c2, %c0_20] : memref<8x256xf32, #tpu.memory_space<vmem>>, vector<1x256xf32>
    %31 = vector.broadcast %30 : vector<1x256xf32> to vector<4x256xf32>
    %32 = arith.addf %29, %31 : vector<4x256xf32>
    %cst_21 = arith.constant 0.000000e+00 : f32
    %33 = vector.broadcast %cst_21 : f32 to vector<4x256xf32>
    %34 = arith.maximumf %32, %33 : vector<4x256xf32>
    %35 = arith.truncf %34 : vector<4x256xf32> to vector<4x256xbf16>
    %c928 = arith.constant 928 : index
    %c0_22 = arith.constant 0 : index
    %36 = vector.load %arg4[%c928, %c0_22] : memref<1184x256xbf16, #tpu.memory_space<vmem>>, vector<256x256xbf16>
    %cst_23 = arith.constant dense<0.000000e+00> : vector<4x256xf32>
    %37 = tpu.matmul %35, %36, %cst_23 {dimension_numbers = #tpu.dot_dimension_numbers<[1], [0], [0], [1], [0, 0, 1, 1], [], []>} : vector<4x256xbf16>, vector<256x256xbf16>, vector<4x256xf32> -> vector<4x256xf32>
    %c3 = arith.constant 3 : index
    %c0_24 = arith.constant 0 : index
    %38 = vector.load %arg6[%c3, %c0_24] : memref<8x256xf32, #tpu.memory_space<vmem>>, vector<1x256xf32>
    %39 = vector.broadcast %38 : vector<1x256xf32> to vector<4x256xf32>
    %40 = arith.addf %37, %39 : vector<4x256xf32>
    %41 = math.tanh %40 : vector<4x256xf32>
    %42 = arith.truncf %41 : vector<4x256xf32> to vector<4x256xbf16>
    %c0_25 = arith.constant 0 : index
    %c0_26 = arith.constant 0 : index
    %43 = vector.load %arg5[%c0_25, %c0_26] : memref<448x128xbf16, #tpu.memory_space<vmem>>, vector<256x128xbf16>
    %cst_27 = arith.constant dense<0.000000e+00> : vector<4x128xf32>
    %44 = tpu.matmul %42, %43, %cst_27 {dimension_numbers = #tpu.dot_dimension_numbers<[1], [0], [0], [1], [0, 0, 1, 1], [], []>} : vector<4x256xbf16>, vector<256x128xbf16>, vector<4x128xf32> -> vector<4x128xf32>
    %c4 = arith.constant 4 : index
    %c0_28 = arith.constant 0 : index
    %45 = vector.load %arg6[%c4, %c0_28] : memref<8x256xf32, #tpu.memory_space<vmem>>, vector<1x128xf32>
    %46 = vector.broadcast %45 : vector<1x128xf32> to vector<4x128xf32>
    %47 = arith.addf %44, %46 : vector<4x128xf32>
    %48 = vector.extract_strided_slice %47 {offsets = [0, 0], sizes = [4, 3], strides = [1, 1]} : vector<4x128xf32> to vector<4x3xf32>
    %cst_29 = arith.constant dense<0xFF800000> : vector<4xf32>
    %49 = vector.multi_reduction <maximumf>, %48, %cst_29 [1] : vector<4x3xf32> to vector<4xf32>
    %50 = vector.shape_cast %49 : vector<4xf32> to vector<4x1xf32>
    %51 = vector.broadcast %50 : vector<4x1xf32> to vector<4x3xf32>
    %52 = arith.subf %48, %51 : vector<4x3xf32>
    %53 = math.exp %52 : vector<4x3xf32>
    %cst_30 = arith.constant dense<0.000000e+00> : vector<4xf32>
    %54 = vector.multi_reduction <add>, %53, %cst_30 [1] : vector<4x3xf32> to vector<4xf32>
    %55 = vector.shape_cast %54 : vector<4xf32> to vector<4x1xf32>
    %56 = tpu.reciprocal %55 {approx = true} : vector<4x1xf32> -> vector<4x1xf32>
    %57 = vector.broadcast %56 : vector<4x1xf32> to vector<4x3xf32>
    %58 = arith.mulf %53, %57 : vector<4x3xf32>
    %59 = vector.extract_strided_slice %58 {offsets = [0, 0], sizes = [4, 1], strides = [1, 1]} : vector<4x3xf32> to vector<4x1xf32>
    %60 = vector.extract_strided_slice %41 {offsets = [0, 0], sizes = [4, 64], strides = [1, 1]} : vector<4x256xf32> to vector<4x64xf32>
    %61 = vector.broadcast %59 : vector<4x1xf32> to vector<4x64xf32>
    %62 = arith.mulf %61, %60 : vector<4x64xf32>
    %63 = vector.extract_strided_slice %58 {offsets = [0, 1], sizes = [4, 1], strides = [1, 1]} : vector<4x3xf32> to vector<4x1xf32>
    %64 = vector.extract_strided_slice %41 {offsets = [0, 64], sizes = [4, 64], strides = [1, 1]} : vector<4x256xf32> to vector<4x64xf32>
    %65 = vector.broadcast %63 : vector<4x1xf32> to vector<4x64xf32>
    %66 = arith.mulf %65, %64 : vector<4x64xf32>
    %67 = arith.addf %62, %66 : vector<4x64xf32>
    %68 = vector.extract_strided_slice %58 {offsets = [0, 2], sizes = [4, 1], strides = [1, 1]} : vector<4x3xf32> to vector<4x1xf32>
    %69 = vector.extract_strided_slice %41 {offsets = [0, 128], sizes = [4, 64], strides = [1, 1]} : vector<4x256xf32> to vector<4x64xf32>
    %70 = vector.broadcast %68 : vector<4x1xf32> to vector<4x64xf32>
    %71 = arith.mulf %70, %69 : vector<4x64xf32>
    %72 = arith.addf %67, %71 : vector<4x64xf32>
    %73 = arith.truncf %72 : vector<4x64xf32> to vector<4x64xbf16>
    %c256_31 = arith.constant 256 : index
    %c0_32 = arith.constant 0 : index
    %74 = vector.load %arg5[%c256_31, %c0_32] : memref<448x128xbf16, #tpu.memory_space<vmem>>, vector<64x128xbf16>
    %cst_33 = arith.constant dense<0.000000e+00> : vector<4x128xf32>
    %75 = tpu.matmul %73, %74, %cst_33 {dimension_numbers = #tpu.dot_dimension_numbers<[1], [0], [0], [1], [0, 0, 1, 1], [], []>} : vector<4x64xbf16>, vector<64x128xbf16>, vector<4x128xf32> -> vector<4x128xf32>
    %c5 = arith.constant 5 : index
    %c0_34 = arith.constant 0 : index
    %76 = vector.load %arg6[%c5, %c0_34] : memref<8x256xf32, #tpu.memory_space<vmem>>, vector<1x128xf32>
    %77 = vector.broadcast %76 : vector<1x128xf32> to vector<4x128xf32>
    %78 = arith.addf %75, %77 : vector<4x128xf32>
    %cst_35 = arith.constant 0.000000e+00 : f32
    %79 = vector.broadcast %cst_35 : f32 to vector<4x128xf32>
    %80 = arith.maximumf %78, %79 : vector<4x128xf32>
    %81 = arith.truncf %80 : vector<4x128xf32> to vector<4x128xbf16>
    %c320 = arith.constant 320 : index
    %c0_36 = arith.constant 0 : index
    %82 = vector.load %arg5[%c320, %c0_36] : memref<448x128xbf16, #tpu.memory_space<vmem>>, vector<128x128xbf16>
    %cst_37 = arith.constant dense<0.000000e+00> : vector<4x128xf32>
    %83 = tpu.matmul %81, %82, %cst_37 {dimension_numbers = #tpu.dot_dimension_numbers<[1], [0], [0], [1], [0, 0, 1, 1], [], []>} : vector<4x128xbf16>, vector<128x128xbf16>, vector<4x128xf32> -> vector<4x128xf32>
    %c6 = arith.constant 6 : index
    %c0_38 = arith.constant 0 : index
    %84 = vector.load %arg6[%c6, %c0_38] : memref<8x256xf32, #tpu.memory_space<vmem>>, vector<1x128xf32>
    %85 = vector.broadcast %84 : vector<1x128xf32> to vector<4x128xf32>
    %86 = arith.addf %83, %85 : vector<4x128xf32>
    %c0_39 = arith.constant 0 : index
    %c0_40 = arith.constant 0 : index
    %87 = vector.load %arg7[%c0_39, %c0_40] : memref<4x128xf32, #tpu.memory_space<vmem>>, vector<4x128xf32>
    tpu.vector_store %arg7[%c0_39, %c0_40], %86 {strides = array<i32>} : memref<4x128xf32, #tpu.memory_space<vmem>>, vector<4x128xf32>,
    return
  }
  func.func @transform_0(%arg0: i32) -> (i32, i32) {
    %c0_i32 = arith.constant 0 : i32
    %c0_i32_0 = arith.constant 0 : i32
    return %arg0, %c0_i32 : i32, i32
  }
  func.func @transform_1(%arg0: i32) -> (i32, i32) {
    %c0_i32 = arith.constant 0 : i32
    %c0_i32_0 = arith.constant 0 : i32
    return %arg0, %c0_i32 : i32, i32
  }
  func.func @transform_2(%arg0: i32) -> (i32, i32) {
    %c0_i32 = arith.constant 0 : i32
    %c0_i32_0 = arith.constant 0 : i32
    return %arg0, %c0_i32 : i32, i32
  }
  func.func @transform_3(%arg0: i32) -> (i32, i32) {
    %c0_i32 = arith.constant 0 : i32
    %c0_i32_0 = arith.constant 0 : i32
    %c0_i32_1 = arith.constant 0 : i32
    return %c0_i32, %c0_i32_0 : i32, i32
  }
  func.func @transform_4(%arg0: i32) -> (i32, i32) {
    %c0_i32 = arith.constant 0 : i32
    %c0_i32_0 = arith.constant 0 : i32
    %c0_i32_1 = arith.constant 0 : i32
    return %c0_i32, %c0_i32_0 : i32, i32
  }
  func.func @transform_5(%arg0: i32) -> (i32, i32) {
    %c0_i32 = arith.constant 0 : i32
    %c0_i32_0 = arith.constant 0 : i32
    %c0_i32_1 = arith.constant 0 : i32
    return %c0_i32, %c0_i32_0 : i32, i32
  }
  func.func @transform_6(%arg0: i32) -> (i32, i32) {
    %c0_i32 = arith.constant 0 : i32
    %c0_i32_0 = arith.constant 0 : i32
    return %arg0, %c0_i32 : i32, i32
  }
}

</mosaic_0001>

<bundles_post_ra>
// kernel: hamf_forward.1
= control target key start
LH: loop header
LB: loop body
LE: loop exit
PB: predicated region body
PF: predicated region fallthrough
CT: control target
= control target key end

     0   :  { %11 = vsyncpa [#allocation3], 0  ;;  %s2471_s0 = inlined_call_operand.hbm [shape: f32[4,256], index: 0, kind: input, shape index: {}]   ;;  %s2472_s1 = inlined_call_operand.hbm [shape: f32[4,128], index: 1, kind: input, shape index: {}]   ;;  %s2473_s2 = inlined_call_operand.hbm [shape: f32[4,32], index: 2, kind: input, shape index: {}]   ;;  %s2474_s3 = inlined_call_operand.hbm [shape: bf16[1184,256], index: 3, kind: input, shape index: {}]   ;;  %s2475_s4 = inlined_call_operand.hbm [shape: bf16[448,128], index: 4, kind: input, shape index: {}]   ;;  %s2476_s5 = inlined_call_operand.hbm [shape: f32[8,256], index: 5, kind: input, shape index: {}]   ;;  %s2477_s6 = inlined_call_operand.vmem [shape: f32[4,128], index: 6, kind: output, shape index: {}]  }
   0x1   :  { %12 = vsyncpa [#allocation5], 0 }
   0x2   :  { %13 = vsyncpa [#allocation8], 0 }
   0x3   :  { %14 = vsyncpa [#allocation11], 0  ;;  %s2365_s21 = smov [#allocation4]   ;;  %s2366_s23 = smov [#allocation7]  }
   0x4   :  { %s31_s22 = sshll.u32 %s2365_s21, 4  ;;  %s50_s24 = sshll.u32 %s2366_s23, 4  ;;  %s32_s22 = int_to_ptr.vmem [resolvable:$true] %s31_s22  ;;  %s51_s24 = int_to_ptr.vmem [resolvable:$true] %s50_s24 }
   0x5   :  { %s2245_s25 = scalar_lea.vmem %s32_s22, 64  ;;  %p2250_p1 = scmp.lt.s32.totalorder %s32_s22, %s32_s22 }
   0x6   :  { %p2246_p0 = scmp.ne.s32.totalorder %s32_s22, %s2245_s25  ;;  %p2251_p2 = scmp.lt.s32.totalorder %s2245_s25, %s2245_s25 }
   0x8   :  { %p2252_p3 = por %p2251_p2, %p2250_p1 }
   0xa   :  { %p2253_p4 = pnand %p2252_p3, %p2246_p0 }
   0xc   :  { %2256 = shalt.err (!%p2253_p4)
}
   0xd   :  { %34 = dma.hbm_to_vmem [thread:$0]  %s2472_s1, 64, %s32_s22, [#allocation5]  }
   0xe   :  { %s2265_s28 = scalar_lea.vmem %s51_s24, 18944  ;;  %p2270_p6 = scmp.lt.s32.totalorder %s51_s24, %s51_s24 }
   0xf   :  { %p2266_p5 = scmp.ne.s32.totalorder %s51_s24, %s2265_s28  ;;  %p2271_p7 = scmp.lt.s32.totalorder %s2265_s28, %s2265_s28 }
  0x11   :  { %p2272_p8 = por %p2271_p7, %p2270_p6 }
  0x13   :  { %p2273_p9 = pnand %p2272_p8, %p2266_p5 }
  0x15   :  { %2276 = shalt.err (!%p2273_p9)
}
  0x16   :  { %s2367_s29 = smov 128   ;;  %s2368_s30 = smov 8  }
  0x17   :  { %56 = dma.hbm_to_vmem [thread:$0]  %s2474_s3, 18944, %s51_s24, [#allocation8], %s2367_s29, %s2367_s29, %s2368_s30  }
  0x18   :  { %s2369_s9 = smov [#allocation2]   ;;  %s2370_s11 = smov [#allocation6]  }
  0x19   :  { %s21_s10 = sshll.u32 %s2369_s9, 4  ;;  %s41_s12 = sshll.u32 %s2370_s11, 4  ;;  %s22_s10 = int_to_ptr.vmem [resolvable:$true] %s21_s10  ;;  %s42_s12 = int_to_ptr.vmem [resolvable:$true] %s41_s12 }
  0x1a   :  { %s2285_s1 = scalar_lea.vmem %s22_s10, 128  ;;  %p2290_p11 = scmp.lt.s32.totalorder %s22_s10, %s22_s10 }
  0x1b   :  { %p2286_p10 = scmp.ne.s32.totalorder %s22_s10, %s2285_s1  ;;  %p2291_p12 = scmp.lt.s32.totalorder %s2285_s1, %s2285_s1 }
  0x1d   :  { %p2292_p13 = por %p2291_p12, %p2290_p11 }
  0x1f   :  { %p2293_p0 = pnand %p2292_p13, %p2286_p10 }
  0x21   :  { %2296 = shalt.err (!%p2293_p0)
}
  0x22   :  { %24 = dma.hbm_to_vmem [thread:$0]  %s2471_s0, 128, %s22_s10, [#allocation3]  }
  0x23   :  { %s2305_s15 = scalar_lea.vmem %s42_s12, 64  ;;  %p2310_p2 = scmp.lt.s32.totalorder %s42_s12, %s42_s12 }
  0x24   :  { %p2306_p1 = scmp.ne.s32.totalorder %s42_s12, %s2305_s15  ;;  %p2311_p3 = scmp.lt.s32.totalorder %s2305_s15, %s2305_s15 }
  0x26   :  { %p2312_p4 = por %p2311_p3, %p2310_p2 }
  0x28   :  { %p2313_p5 = pnand %p2312_p4, %p2306_p1 }
  0x2a   :  { %2316 = shalt.err (!%p2313_p5)
}
  0x2b   :  { %44 = dma.hbm_to_vmem [thread:$0]  %s2473_s2, 64, %s42_s12, [#allocation5]  }
  0x2c   :  { %s2371_s17 = smov [#allocation9]  }
  0x2d   :  { %s62_s18 = sshll.u32 %s2371_s17, 4  ;;  %s63_s18 = int_to_ptr.vmem [resolvable:$true] %s62_s18 }
  0x2e   :  { %s2325_s19 = scalar_lea.vmem %s63_s18, 3584  ;;  %p2330_p7 = scmp.lt.s32.totalorder %s63_s18, %s63_s18 }
  0x2f   :  { %p2326_p6 = scmp.ne.s32.totalorder %s63_s18, %s2325_s19  ;;  %p2331_p8 = scmp.lt.s32.totalorder %s2325_s19, %s2325_s19 }
  0x31   :  { %p2332_p9 = por %p2331_p8, %p2330_p7 }
  0x33   :  { %p2333_p10 = pnand %p2332_p9, %p2326_p6 }
  0x35   :  { %2336 = shalt.err (!%p2333_p10)
}
  0x36   :  { %s2372_s0 = smov 64   ;;  %s2373_s20 = smov 4  }
  0x37   :  { %68 = dma.hbm_to_vmem [thread:$0]  %s2475_s4, 3584, %s63_s18, [#allocation8], %s2372_s0, %s2372_s0, %s2373_s20  }
  0x38   :  { %s2374_s23 = smov [#allocation10]  }
  0x39   :  { %s75_s2 = sshll.u32 %s2374_s23, 4  ;;  %s76_s2 = int_to_ptr.vmem [resolvable:$true] %s75_s2 }
  0x3a   :  { %s2345_s24 = scalar_lea.vmem %s76_s2, 256  ;;  %p2350_p12 = scmp.lt.s32.totalorder %s76_s2, %s76_s2 }
  0x3b   :  { %p2346_p11 = scmp.ne.s32.totalorder %s76_s2, %s2345_s24  ;;  %p2351_p13 = scmp.lt.s32.totalorder %s2345_s24, %s2345_s24 }
  0x3d   :  { %p2352_p0 = por %p2351_p13, %p2350_p12 }
  0x3f   :  { %p2353_p1 = pnand %p2352_p0, %p2346_p11 }
  0x41   :  { %2356 = shalt.err (!%p2353_p1)
}
  0x42   :  { %78 = dma.hbm_to_vmem [thread:$0]  %s2476_s5, 256, %s76_s2, [#allocation11]  }
  0x43   :  { %2357 = dma.done.wait [#allocation3], 128  }
  0x44   :  { %2358 = vsyncadd [#allocation3], 4294967168 }
  0x45   :  { %2359 = dma.done.wait [#allocation5], 128  }
  0x46   :  { %2360 = vsyncadd [#allocation5], 4294967168 }
  0x47   :  { %2361 = dma.done.wait [#allocation8], 22528  }
  0x48   :  { %2362 = vsyncadd [#allocation8], 4294944768 }
  0x49   :  { %2363 = dma.done.wait [#allocation11], 256  }
  0x4a   :  { %2364 = vsyncadd [#allocation11], 4294967040  ;;  %v2375_v0 = vmov 0   ;;  %v1978_v1 = vld [vmem:[#allocation7 + $0x74] ss:$8 sps:$4 sm:$0xff]   ;;  %vm502_vm0 = vcmask 261120  }
  0x4b   :  { %266 = vmatprep.mubr.bf16.mxu0 %v2375_v0  ;;  %v1980_v2 = vld [vmem:[#allocation7 + $0x70] ss:$8 sps:$4 sm:$0xff]   ;;  %435 = vmatprep.subr.bf16.mxu1 %v1978_v1  ;;  %v1981_v3 = vld [vmem:[#allocation7 + $0x64] ss:$8 sps:$4 sm:$0xff]   ;;  %v1983_v4 = vld [vmem:[#allocation7 + $0x60] ss:$8 sps:$4 sm:$0xff]  }
  0x4c   :  { %436 = vmatpush1.bf16.msra.mxu1 %v1980_v2  ;;  %v1984_v5 = vld [vmem:[#allocation7 + $0x54] ss:$8 sps:$4 sm:$0xff]   ;;  %v1986_v6 = vld [vmem:[#allocation7 + $0x50] ss:$8 sps:$4 sm:$0xff]   ;;  %v1987_v7 = vld [vmem:[#allocation7 + $0x44] ss:$8 sps:$4 sm:$0xff]  }
  0x4d   :  { %437 = vmatprep.subr.bf16.mxu1 %v1981_v3  ;;  %v1989_v8 = vld [vmem:[#allocation7 + $0x40] ss:$8 sps:$4 sm:$0xff]   ;;  %v2002_v9 = vld [vmem:[#allocation7 + $0x174] ss:$8 sps:$4 sm:$0xff]   ;;  %v2006_v11 = vld [vmem:[#allocation7 + $0x170] ss:$8 sps:$4 sm:$0xff]  }
  0x4e   :  { %v1990_v10 = vld [vmem:[#allocation7 + $0x34] ss:$8 sps:$4 sm:$0xff]   ;;  %234 = vmatprep.subr.bf16.mxu0 %v2002_v9  ;;  %v2008_v12 = vld [vmem:[#allocation7 + $0x164] ss:$8 sps:$4 sm:$0xff]   ;;  %v1992_v13 = vld [vmem:[#allocation7 + $0x30] ss:$8 sps:$4 sm:$0xff]  }
  0x4f   :  { %235 = vmatpush1.bf16.msra.mxu0 %v2006_v11  ;;  %v1993_v14 = vld [vmem:[#allocation7 + $0x24] ss:$8 sps:$4 sm:$0xff]   ;;  %v2012_v15 = vld [vmem:[#allocation7 + $0x160] ss:$8 sps:$4 sm:$0xff]   ;;  %v2014_v16 = vld [vmem:[#allocation7 + $0x154] ss:$8 sps:$4 sm:$0xff]  }
  0x50   :  { %438 = vmatpush1.bf16.msra.mxu1 %v1983_v4  ;;  %236 = vmatprep.subr.bf16.mxu0 %v2008_v12  ;;  %v1995_v17 = vld [vmem:[#allocation7 + $0x20] ss:$8 sps:$4 sm:$0xff]   ;;  %v2018_v18 = vld [vmem:[#allocation7 + $0x150] ss:$8 sps:$4 sm:$0xff]   ;;  %v2020_v19 = vld [vmem:[#allocation7 + $0x144] ss:$8 sps:$4 sm:$0xff]  }
  0x51   :  { %439 = vmatprep.subr.bf16.mxu1 %v1984_v5  ;;  %v1996_v20 = vld [vmem:[#allocation7 + $0x14] ss:$8 sps:$4 sm:$0xff]   ;;  %v2024_v21 = vld [vmem:[#allocation7 + $0x140] ss:$8 sps:$4 sm:$0xff]   ;;  %v1998_v22 = vld [vmem:[#allocation7 + $0x10] ss:$8 sps:$4 sm:$0xff]  }
  0x52   :  { %v2026_v23 = vld [vmem:[#allocation7 + $0x134] ss:$8 sps:$4 sm:$0xff]   ;;  %v1999_v24 = vld [vmem:[#allocation7 + $0x4] ss:$8 sps:$4 sm:$0xff]   ;;  %v2001_v25 = vld [vmem:[#allocation7] ss:$8 sps:$4 sm:$0xff]  }
  0x53   :  { %237 = vmatpush1.bf16.msra.mxu0 %v2012_v15  ;;  %v2030_v26 = vld [vmem:[#allocation7 + $0x130] ss:$8 sps:$4 sm:$0xff]   ;;  %v2032_v27 = vld [vmem:[#allocation7 + $0x124] ss:$8 sps:$4 sm:$0xff]   ;;  %v2004_v28 = vld [vmem:[#allocation7 + $0xf4] ss:$8 sps:$4 sm:$0xff]  }
  0x54   :  { %440 = vmatpush1.bf16.msra.mxu1 %v1986_v6  ;;  %238 = vmatprep.subr.bf16.mxu0 %v2014_v16  ;;  %v2036_v29 = vld [vmem:[#allocation7 + $0x120] ss:$8 sps:$4 sm:$0xff]   ;;  %v2007_v30 = vld [vmem:[#allocation7 + $0xf0] ss:$8 sps:$4 sm:$0xff]   ;;  %v2038_v31 = vld [vmem:[#allocation7 + $0x114] ss:$8 sps:$4 sm:$0xff]  }
  0x55   :  { %441 = vmatprep.subr.bf16.mxu1 %v1987_v7  ;;  %v2010_v32 = vld [vmem:[#allocation7 + $0xe4] ss:$8 sps:$4 sm:$0xff]   ;;  %v2436_v33 = vld [vmem:[#allocation2] sm:$0xff]  ;;  %v2013_v36 = vld [vmem:[#allocation7 + $0xe0] ss:$8 sps:$4 sm:$0xff]   ;;  %vm1486_vm1 = vcmask 19456  }
  0x56   :  { %v100_v34 = vcombine.high %v2436_v33, %v2436_v33  ;;  %v2042_v35 = vld [vmem:[#allocation7 + $0x110] ss:$8 sps:$4 sm:$0xff]   ;;  %v2044_v37 = vld [vmem:[#allocation7 + $0x104] ss:$8 sps:$4 sm:$0xff]   ;;  %v2016_v39 = vld [vmem:[#allocation7 + $0xd4] ss:$8 sps:$4 sm:$0xff]   ;;  %v102_v5 = vpack.c.bf16 %v2436_v33, %v2436_v33 }
  0x57   :  { %239 = vmatpush1.bf16.msra.mxu0 %v2018_v18  ;;  %v2048_v40 = vld [vmem:[#allocation7 + $0x100] ss:$8 sps:$4 sm:$0xff]   ;;  %v136_v41 = vld [vmem:[#allocation4] sm:$0xf]  ;;  %v2059_v43 = vld [vmem:[#allocation7 + $0x214] ss:$8 sps:$4 sm:$0xff]  }
  0x58   :  { %442 = vmatpush1.bf16.msra.mxu1 %v1989_v8  ;;  %240 = vmatprep.subr.bf16.mxu0 %v2020_v19  ;;  %v103_v38 = vpack.c.bf16 %v100_v34, %v100_v34  ;;  %v2019_v42 = vld [vmem:[#allocation7 + $0xd0] ss:$8 sps:$4 sm:$0xff]   ;;  %v2022_v44 = vld [vmem:[#allocation7 + $0xc4] ss:$8 sps:$4 sm:$0xff]   ;;  %v137_v45 = vpack.c.bf16 %v136_v41, %v136_v41  ;;  %v2025_v47 = vld [vmem:[#allocation7 + $0xc0] ss:$8 sps:$4 sm:$0xff]  }
  0x59   :  { %443 = vmatprep.subr.bf16.mxu1 %v1990_v10  ;;  %v2057_v46 = vld [vmem:[#allocation7 + $0x210] ss:$8 sps:$4 sm:$0xff]   ;;  %v2062_v48 = vld [vmem:[#allocation7 + $0x204] ss:$8 sps:$4 sm:$0xff]   ;;  %v2028_v49 = vld [vmem:[#allocation7 + $0xb4] ss:$8 sps:$4 sm:$0xff]  }
  0x5a   :  { %467 = vmatprep.mubr.bf16.mxu1 %v103_v38  ;;  %v2060_v50 = vld [vmem:[#allocation7 + $0x200] ss:$8 sps:$4 sm:$0xff]   ;;  %v2031_v51 = vld [vmem:[#allocation7 + $0xb0] ss:$8 sps:$4 sm:$0xff]   ;;  %v2065_v52 = vld [vmem:[#allocation7 + $0x1f4] ss:$8 sps:$4 sm:$0xff]  }
  0x5b   :  { %241 = vmatpush1.bf16.msra.mxu0 %v2024_v21  ;;  %v2034_v53 = vld [vmem:[#allocation7 + $0xa4] ss:$8 sps:$4 sm:$0xff]   ;;  %v2037_v54 = vld [vmem:[#allocation7 + $0xa0] ss:$8 sps:$4 sm:$0xff]   ;;  %v2063_v55 = vld [vmem:[#allocation7 + $0x1f0] ss:$8 sps:$4 sm:$0xff]  }
  0x5c   :  { %444 = vmatpush1.bf16.msra.mxu1 %v1992_v13  ;;  %242 = vmatprep.subr.bf16.mxu0 %v2026_v23  ;;  %v2040_v56 = vld [vmem:[#allocation7 + $0x94] ss:$8 sps:$4 sm:$0xff]   ;;  %v2068_v57 = vld [vmem:[#allocation7 + $0x1e4] ss:$8 sps:$4 sm:$0xff]   ;;  %v2066_v58 = vld [vmem:[#allocation7 + $0x1e0] ss:$8 sps:$4 sm:$0xff]  }
  0x5d   :  { %445 = vmatprep.subr.bf16.mxu1 %v1993_v14  ;;  %v2043_v59 = vld [vmem:[#allocation7 + $0x90] ss:$8 sps:$4 sm:$0xff]   ;;  %v2071_v60 = vld [vmem:[#allocation7 + $0x1d4] ss:$8 sps:$4 sm:$0xff]   ;;  %v2046_v61 = vld [vmem:[#allocation7 + $0x84] ss:$8 sps:$4 sm:$0xff]  }
  0x5e   :  { %v2069_v62 = vld [vmem:[#allocation7 + $0x1d0] ss:$8 sps:$4 sm:$0xff]   ;;  %v2049_v63 = vld [vmem:[#allocation7 + $0x80] ss:$8 sps:$4 sm:$0xff]   ;;  %v2074_v1 = vld [vmem:[#allocation7 + $0x1c4] ss:$8 sps:$4 sm:$0xff]  }
  0x5f   :  { %243 = vmatpush1.bf16.msra.mxu0 %v2030_v26  ;;  %v2053_v2 = vld [vmem:[#allocation7 + $0x194] ss:$8 sps:$4 sm:$0xff]   ;;  %v2072_v3 = vld [vmem:[#allocation7 + $0x1c0] ss:$8 sps:$4 sm:$0xff]   ;;  %v2051_v4 = vld [vmem:[#allocation7 + $0x190] ss:$8 sps:$4 sm:$0xff]  }
  0x60   :  { %446 = vmatpush1.bf16.msra.mxu1 %v1995_v17  ;;  %244 = vmatprep.subr.bf16.mxu0 %v2032_v27  ;;  %v2056_v6 = vld [vmem:[#allocation7 + $0x184] ss:$8 sps:$4 sm:$0xff]   ;;  %v2077_v7 = vld [vmem:[#allocation7 + $0x1b4] ss:$8 sps:$4 sm:$0xff]   ;;  %v2075_v8 = vld [vmem:[#allocation7 + $0x1b0] ss:$8 sps:$4 sm:$0xff]  }
  0x61   :  { %447 = vmatprep.subr.bf16.mxu1 %v1996_v20  ;;  %v2054_v9 = vld [vmem:[#allocation7 + $0x180] ss:$8 sps:$4 sm:$0xff]   ;;  %v476_v10 = vld [vmem:[#allocation6] sm:$0xf]  ;;  %v2080_v11 = vld [vmem:[#allocation7 + $0x1a4] ss:$8 sps:$4 sm:$0xff]  }
  0x62   :  { %v2078_v12 = vld [vmem:[#allocation7 + $0x1a0] ss:$8 sps:$4 sm:$0xff]   ;;  %v2083_v13 = vld [vmem:[#allocation7 + $0x294] ss:$8 sps:$4 sm:$0xff]   ;;  %v477_v14 = vpack.c.bf16 %v476_v10, %v476_v10  ;;  %v2081_v15 = vld [vmem:[#allocation7 + $0x290] ss:$8 sps:$4 sm:$0xff]  }
  0x63   :  { %245 = vmatpush1.bf16.msra.mxu0 %v2036_v29  ;;  %v2086_v16 = vld [vmem:[#allocation7 + $0x284] ss:$8 sps:$4 sm:$0xff]   ;;  %v2084_v17 = vld [vmem:[#allocation7 + $0x280] ss:$8 sps:$4 sm:$0xff]   ;;  %v2089_v18 = vld [vmem:[#allocation7 + $0x274] ss:$8 sps:$4 sm:$0xff]  }
  0x64   :  { %448 = vmatpush1.bf16.msra.mxu1 %v1998_v22  ;;  %246 = vmatprep.subr.bf16.mxu0 %v2038_v31  ;;  %v2087_v19 = vld [vmem:[#allocation7 + $0x270] ss:$8 sps:$4 sm:$0xff]   ;;  %v2092_v20 = vld [vmem:[#allocation7 + $0x264] ss:$8 sps:$4 sm:$0xff]   ;;  %v2090_v21 = vld [vmem:[#allocation7 + $0x260] ss:$8 sps:$4 sm:$0xff]  }
  0x65   :  { %449 = vmatprep.subr.bf16.mxu1 %v1999_v24  ;;  %v2095_v22 = vld [vmem:[#allocation7 + $0x254] ss:$8 sps:$4 sm:$0xff]   ;;  %v2093_v23 = vld [vmem:[#allocation7 + $0x250] ss:$8 sps:$4 sm:$0xff]   ;;  %v2098_v24 = vld [vmem:[#allocation7 + $0x244] ss:$8 sps:$4 sm:$0xff]  }
  0x66   :  { %v2101_v26 = vld [vmem:[#allocation7 + $0x234] ss:$8 sps:$4 sm:$0xff]   ;;  %v2099_v27 = vld [vmem:[#allocation7 + $0x230] ss:$8 sps:$4 sm:$0xff]   ;;  %v2102_v29 = vld [vmem:[#allocation7 + $0x220] ss:$8 sps:$4 sm:$0xff]  }
  0x67   :  { %247 = vmatpush1.bf16.msra.mxu0 %v2042_v35  ;;  %v2107_v31 = vld [vmem:[#allocation7 + $0x314] ss:$8 sps:$4 sm:$0xff]   ;;  %v2108_v33 = vld [vmem:[#allocation7 + $0x300] ss:$8 sps:$4 sm:$0xff]   ;;  %v2111_v35 = vld [vmem:[#allocation7 + $0x2f0] ss:$8 sps:$4 sm:$0xff]  }
  0x68   :  { %450 = vmatpush1.bf16.msra.mxu1 %v2001_v25  ;;  %248 = vmatprep.subr.bf16.mxu0 %v2044_v37  ;;  %v2096_v25 = vld [vmem:[#allocation7 + $0x240] ss:$8 sps:$4 sm:$0xff]   ;;  %v2113_v34 = vld [vmem:[#allocation7 + $0x2f4] ss:$8 sps:$4 sm:$0xff]   ;;  %vm2379_vm2 = vmmov 0   ;;  %vm1554_vm3 = vcmask 523264  }
  0x69   :  { %451 = vmatprep.subr.bf16.mxu1 %v2004_v28  ;;  %v2104_v28 = vld [vmem:[#allocation7 + $0x224] ss:$8 sps:$4 sm:$0xff]   ;;  %v2114_v37 = vld [vmem:[#allocation7 + $0x2e0] ss:$8 sps:$4 sm:$0xff]   ;;  %v2119_v38 = vld [vmem:[#allocation7 + $0x2d4] ss:$8 sps:$4 sm:$0xff]  }
  0x6a   :  { %v2120_v41 = vld [vmem:[#allocation7 + $0x2c0] ss:$8 sps:$4 sm:$0xff]  }
  0x6b   :  { %249 = vmatpush1.bf16.msra.mxu0 %v2048_v40  ;;  %v2122_v40 = vld [vmem:[#allocation7 + $0x2c4] ss:$8 sps:$4 sm:$0xff]  }
  0x6c   :  { %452 = vmatpush2.bf16.msra.mxu1 %v2007_v30  ;;  %772 = vmatprep.subr.bf16.mxu0 %v2059_v43  ;;  %v2105_v30 = vld [vmem:[#allocation7 + $0x310] ss:$8 sps:$4 sm:$0xff]  }
  0x6d   :  { %453 = vmatprep.subr.bf16.mxu1 %v2010_v32  ;;  %v2110_v32 = vld [vmem:[#allocation7 + $0x304] ss:$8 sps:$4 sm:$0xff]   ;;  %v2123_v43 = vld [vmem:[#allocation7 + $0x2b0] ss:$8 sps:$4 sm:$0xff]  }
  0x6e   :  { %267 = vmatmul.mubr.bf16.vlgmr.msra.gmra.mxu0 %v137_v45  ;;  %v2126_v45 = vld [vmem:[#allocation7 + $0x2a0] ss:$8 sps:$4 sm:$0xff]  }
  0x6f   :  { %773 = vmatpush1.bf16.msra.mxu0 %v2057_v46  ;;  %v2131_v46 = vld [vmem:[#allocation7 + $0x394] ss:$8 sps:$4 sm:$0xff]  }
  0x70   :  { %454 = vmatpush2.bf16.msra.mxu1 %v2013_v36  ;;  %774 = vmatprep.subr.bf16.mxu0 %v2062_v48  ;;  %v2116_v36 = vld [vmem:[#allocation7 + $0x2e4] ss:$8 sps:$4 sm:$0xff]  }
  0x71   :  { %455 = vmatprep.subr.bf16.mxu1 %v2016_v39  ;;  %v2117_v39 = vld [vmem:[#allocation7 + $0x2d0] ss:$8 sps:$4 sm:$0xff]   ;;  %v2134_v48 = vld [vmem:[#allocation7 + $0x384] ss:$8 sps:$4 sm:$0xff]  }
  0x73   :  { %775 = vmatpush1.bf16.msra.mxu0 %v2060_v50  ;;  %v2137_v50 = vld [vmem:[#allocation7 + $0x374] ss:$8 sps:$4 sm:$0xff]  }
  0x74   :  { %456 = vmatpush2.bf16.msra.mxu1 %v2019_v42  ;;  %776 = vmatprep.subr.bf16.mxu0 %v2065_v52  ;;  %v2125_v42 = vld [vmem:[#allocation7 + $0x2b4] ss:$8 sps:$4 sm:$0xff]   ;;  %v2140_v52 = vld [vmem:[#allocation7 + $0x364] ss:$8 sps:$4 sm:$0xff]  }
  0x75   :  { %457 = vmatprep.subr.bf16.mxu1 %v2022_v44  ;;  %v2128_v44 = vld [vmem:[#allocation7 + $0x2a4] ss:$8 sps:$4 sm:$0xff]  }
  0x77   :  { %777 = vmatpush1.bf16.msra.mxu0 %v2063_v55  ;;  %v2141_v55 = vld [vmem:[#allocation7 + $0x350] ss:$8 sps:$4 sm:$0xff]  }
  0x78   :  { %458 = vmatpush2.bf16.msra.mxu1 %v2025_v47  ;;  %778 = vmatprep.subr.bf16.mxu0 %v2068_v57  ;;  %v2129_v47 = vld [vmem:[#allocation7 + $0x390] ss:$8 sps:$4 sm:$0xff]   ;;  %v2144_v57 = vld [vmem:[#allocation7 + $0x340] ss:$8 sps:$4 sm:$0xff]  }
  0x79   :  { %459 = vmatprep.subr.bf16.mxu1 %v2028_v49  ;;  %v2132_v49 = vld [vmem:[#allocation7 + $0x380] ss:$8 sps:$4 sm:$0xff]  }
  0x7b   :  { %779 = vmatpush1.bf16.msra.mxu0 %v2066_v58 }
  0x7c   :  { %460 = vmatpush2.bf16.msra.mxu1 %v2031_v51  ;;  %780 = vmatprep.subr.bf16.mxu0 %v2071_v60  ;;  %v2135_v51 = vld [vmem:[#allocation7 + $0x370] ss:$8 sps:$4 sm:$0xff]  }
  0x7d   :  { %461 = vmatprep.subr.bf16.mxu1 %v2034_v53  ;;  %v2138_v53 = vld [vmem:[#allocation7 + $0x360] ss:$8 sps:$4 sm:$0xff]  }
  0x7f   :  { %781 = vmatpush1.bf16.msra.mxu0 %v2069_v62  ;;  %v551_v62 = vlaneseq }
  0x80   :  { %462 = vmatpush2.bf16.msra.mxu1 %v2037_v54  ;;  %782 = vmatprep.subr.bf16.mxu0 %v2074_v1  ;;  %v2143_v54 = vld [vmem:[#allocation7 + $0x354] ss:$8 sps:$4 sm:$0xff]  }
  0x81   :  { %463 = vmatprep.subr.bf16.mxu1 %v2040_v56  ;;  %v2146_v56 = vld [vmem:[#allocation7 + $0x344] ss:$8 sps:$4 sm:$0xff]  }
  0x83   :  { %783 = vmatpush1.bf16.msra.mxu0 %v2072_v3 }
  0x84   :  { %464 = vmatpush2.bf16.msra.mxu1 %v2043_v59  ;;  %784 = vmatprep.subr.bf16.mxu0 %v2077_v7 }
  0x85   :  { %465 = vmatprep.subr.bf16.mxu1 %v2046_v61 }
  0x87   :  { %785 = vmatpush1.bf16.msra.mxu0 %v2075_v8 }
  0x88   :  { %466 = vmatpush2.bf16.msra.mxu1 %v2049_v63  ;;  %786 = vmatprep.subr.bf16.mxu0 %v2080_v11  ;;  %v552_v63 = vshrl.u32 %v551_v62, 7 }
  0x89   :  { %518 = vmatprep.subr.bf16.mxu1 %v2053_v2 }
  0x8a   :  { %v2443_v3 = vsub.s32 0, %v552_v63 }
  0x8b   :  { %468 = vmatmul.mubr.bf16.vlgmr.msra.gmra.mxu1 %v102_v5  ;;  %787 = vmatpush1.bf16.msra.mxu0 %v2078_v12  ;;  %v549_v5 = vld [vmem:[#allocation10] ss:$8 sm:$0x3] }
  0x8c   :  { %519 = vmatpush1.bf16.msra.mxu1 %v2051_v4  ;;  %538 = vmatprep.mubr.bf16.mxu1 %v2375_v0 }
  0x8d   :  { %520 = vmatprep.subr.bf16.mxu1 %v2056_v6  ;;  %788 = vmatprep.subr.bf16.mxu0 %v2083_v13  ;;  %v2445_v6 = vsub.s32 1, %v552_v63 }
  0x8f   :  { %789 = vmatpush2.bf16.msra.mxu0 %v2081_v15  ;;  %v558_v13 = vrot.slane %v549_v5, %v2445_v6 }
  0x90   :  { %521 = vmatpush1.bf16.msra.mxu1 %v2054_v9  ;;  %790 = vmatprep.subr.bf16.mxu0 %v2086_v16  ;;  %v554_v9 = vrot.slane %v549_v5, %v2443_v3 }
  0x91   :  { %1022 = vmatprep.subr.bf16.mxu1 %v2107_v31  ;;  %v2156_v31 = vld [vmem:[#allocation7 + $0x400] ss:$8 sps:$4 sm:$0xff]  }
  0x93   :  { %1766 = vmatmul.mubr.msk.bf16.vlgmr.msra.gmra.mxu1 %vm502_vm0, %v477_v14  ;;  %791 = vmatpush2.bf16.msra.mxu0 %v2084_v17 }
  0x94   :  { %792 = vmatprep.subr.bf16.mxu0 %v2089_v18  ;;  %1023 = vmatpush1.bf16.msra.mxu1 %v2105_v30  ;;  %v2158_v30 = vld [vmem:[#allocation7 + $0x404] ss:$8 sps:$4 sm:$0xff]  }
  0x95   :  { %1024 = vmatprep.subr.bf16.mxu1 %v2110_v32  ;;  %v2161_v32 = vld [vmem:[#allocation7 + $0x3f4] ss:$8 sps:$4 sm:$0xff]  }
  0x97   :  { %793 = vmatpush2.bf16.msra.mxu0 %v2087_v19 }
  0x98   :  { %794 = vmatprep.subr.bf16.mxu0 %v2092_v20  ;;  %1025 = vmatpush1.bf16.msra.mxu1 %v2108_v33  ;;  %v2159_v33 = vld [vmem:[#allocation7 + $0x3f0] ss:$8 sps:$4 sm:$0xff]  }
  0x99   :  { %1026 = vmatprep.subr.bf16.mxu1 %v2113_v34  ;;  %v2164_v34 = vld [vmem:[#allocation7 + $0x3e4] ss:$8 sps:$4 sm:$0xff]  }
  0x9b   :  { %795 = vmatpush2.bf16.msra.mxu0 %v2090_v21 }
  0x9c   :  { %796 = vmatprep.subr.bf16.mxu0 %v2095_v22  ;;  %1027 = vmatpush1.bf16.msra.mxu1 %v2111_v35  ;;  %v2162_v35 = vld [vmem:[#allocation7 + $0x3e0] ss:$8 sps:$4 sm:$0xff]  }
  0x9d   :  { %1028 = vmatprep.subr.bf16.mxu1 %v2116_v36  ;;  %v2167_v36 = vld [vmem:[#allocation7 + $0x3d4] ss:$8 sps:$4 sm:$0xff]  }
  0x9f   :  { %797 = vmatpush2.bf16.msra.mxu0 %v2093_v23 }
  0xa0   :  { %798 = vmatprep.subr.bf16.mxu0 %v2098_v24  ;;  %1029 = vmatpush1.bf16.msra.mxu1 %v2114_v37  ;;  %v2149_v24 = vld [vmem:[#allocation7 + $0x334] ss:$8 sps:$4 sm:$0xff]   ;;  %v2165_v37 = vld [vmem:[#allocation7 + $0x3d0] ss:$8 sps:$4 sm:$0xff]  }
  0xa1   :  { %1030 = vmatprep.subr.bf16.mxu1 %v2119_v38  ;;  %v2170_v38 = vld [vmem:[#allocation7 + $0x3c4] ss:$8 sps:$4 sm:$0xff]  }
  0xa3   :  { %799 = vmatpush2.bf16.msra.mxu0 %v2096_v25  ;;  %v2147_v25 = vld [vmem:[#allocation7 + $0x330] ss:$8 sps:$4 sm:$0xff]  }
  0xa4   :  { %800 = vmatprep.subr.bf16.mxu0 %v2101_v26  ;;  %1031 = vmatpush1.bf16.msra.mxu1 %v2117_v39  ;;  %v2152_v26 = vld [vmem:[#allocation7 + $0x324] ss:$8 sps:$4 sm:$0xff]   ;;  %v2168_v39 = vld [vmem:[#allocation7 + $0x3c0] ss:$8 sps:$4 sm:$0xff]  }
  0xa5   :  { %1032 = vmatprep.subr.bf16.mxu1 %v2122_v40  ;;  %v2173_v40 = vld [vmem:[#allocation7 + $0x3b4] ss:$8 sps:$4 sm:$0xff]  }
  0xa7   :  { %801 = vmatpush2.bf16.msra.mxu0 %v2099_v27  ;;  %v2150_v27 = vld [vmem:[#allocation7 + $0x320] ss:$8 sps:$4 sm:$0xff]  }
  0xa8   :  { %802 = vmatprep.subr.bf16.mxu0 %v2104_v28  ;;  %1033 = vmatpush1.bf16.msra.mxu1 %v2120_v41  ;;  %v2153_v28 = vld [vmem:[#allocation7 + $0x410] ss:$8 sps:$4 sm:$0xff]  }
  0xa9   :  { %1034 = vmatprep.subr.bf16.mxu1 %v2125_v42  ;;  %v2171_v41 = vld [vmem:[#allocation7 + $0x3b0] ss:$8 sps:$4 sm:$0xff]   ;;  %v2176_v42 = vld [vmem:[#allocation7 + $0x3a4] ss:$8 sps:$4 sm:$0xff]  }
  0xab   :  { %803 = vmatpush2.bf16.msra.mxu0 %v2102_v29  ;;  %v2155_v29 = vld [vmem:[#allocation7 + $0x414] ss:$8 sps:$4 sm:$0xff]  }
  0xac   :  { %1035 = vmatpush1.bf16.msra.mxu1 %v2123_v43  ;;  %1272 = vmatprep.subr.bf16.mxu0 %v2155_v29  ;;  %v2174_v43 = vld [vmem:[#allocation7 + $0x3a0] ss:$8 sps:$4 sm:$0xff]  }
  0xad   :  { %1036 = vmatprep.subr.bf16.mxu1 %v2128_v44  ;;  %v2179_v44 = vld [vmem:[#allocation7 + $0x494] ss:$8 sps:$4 sm:$0xff]  }
  0xb0   :  { %1037 = vmatpush1.bf16.msra.mxu1 %v2126_v45  ;;  %v2177_v45 = vld [vmem:[#allocation7 + $0x490] ss:$8 sps:$4 sm:$0xff]  }
  0xb1   :  { %1038 = vmatprep.subr.bf16.mxu1 %v2131_v46  ;;  %v2182_v46 = vld [vmem:[#allocation7 + $0x484] ss:$8 sps:$4 sm:$0xff]  }
  0xb4   :  { %1039 = vmatpush2.bf16.msra.mxu1 %v2129_v47  ;;  %v2180_v47 = vld [vmem:[#allocation7 + $0x480] ss:$8 sps:$4 sm:$0xff]  }
  0xb5   :  { %1040 = vmatprep.subr.bf16.mxu1 %v2134_v48  ;;  %v2185_v48 = vld [vmem:[#allocation7 + $0x474] ss:$8 sps:$4 sm:$0xff]  }
  0xb8   :  { %1041 = vmatpush2.bf16.msra.mxu1 %v2132_v49  ;;  %v2183_v49 = vld [vmem:[#allocation7 + $0x470] ss:$8 sps:$4 sm:$0xff]  }
  0xb9   :  { %1042 = vmatprep.subr.bf16.mxu1 %v2137_v50  ;;  %v2188_v50 = vld [vmem:[#allocation7 + $0x464] ss:$8 sps:$4 sm:$0xff]  }
  0xbc   :  { %1043 = vmatpush2.bf16.msra.mxu1 %v2135_v51  ;;  %v2186_v51 = vld [vmem:[#allocation7 + $0x460] ss:$8 sps:$4 sm:$0xff]  }
  0xbd   :  { %1044 = vmatprep.subr.bf16.mxu1 %v2140_v52  ;;  %v2191_v52 = vld [vmem:[#allocation7 + $0x454] ss:$8 sps:$4 sm:$0xff]  }
  0xc0   :  { %1045 = vmatpush2.bf16.msra.mxu1 %v2138_v53  ;;  %v2189_v53 = vld [vmem:[#allocation7 + $0x450] ss:$8 sps:$4 sm:$0xff]  }
  0xc1   :  { %1046 = vmatprep.subr.bf16.mxu1 %v2143_v54  ;;  %v2194_v54 = vld [vmem:[#allocation7 + $0x444] ss:$8 sps:$4 sm:$0xff]  }
  0xc4   :  { %1047 = vmatpush2.bf16.msra.mxu1 %v2141_v55  ;;  %v2192_v55 = vld [vmem:[#allocation7 + $0x440] ss:$8 sps:$4 sm:$0xff]  }
  0xc5   :  { %1048 = vmatprep.subr.bf16.mxu1 %v2146_v56  ;;  %v600_v56 = vld [vmem:[#allocation10 + $0x1] ss:$8 sm:$0x3] }
  0xc8   :  { %1049 = vmatpush2.bf16.msra.mxu1 %v2144_v57  ;;  %v605_v57 = vrot.slane %v600_v56, %v2443_v3 }
  0xc9   :  { %1050 = vmatprep.subr.bf16.mxu1 %v2149_v24 }
  0xcc   :  { %1051 = vmatpush2.bf16.msra.mxu1 %v2147_v25 }
  0xcd   :  { %1052 = vmatprep.subr.bf16.mxu1 %v2152_v26 }
  0xd0   :  { %1053 = vmatpush2.bf16.msra.mxu1 %v2150_v27 }
 0x12e   :  { %v268_v58 = vpop.f32.mrf.mxu0 }
 0x130   :  { %v270_v59 = vpop.f32.mrf.mxu0 }
 0x132   :  { %v272_v60 = vpop.f32.mrf.mxu0 }
 0x134   :  { %v273_v61 = vpop.f32.mrf.mxu0 }
 0x14b   :  { %v469_v1 = vpop.f32.mrf.mxu1 }
 0x14c   :  { %v470_v8 = vadd.f32 %v469_v1, %v268_v58  ;;  %v609_v58 = vrot.slane %v600_v56, %v2445_v6 }
 0x14d   :  { %v471_v2 = vpop.f32.mrf.mxu1 }
 0x14e   :  { %v472_v11 = vadd.f32 %v471_v2, %v270_v59 }
 0x14f   :  { %v473_v4 = vpop.f32.mrf.mxu1 }
 0x151   :  { %v474_v7 = vpop.f32.mrf.mxu1 }
 0x153   :  { %v540_v10 = vpop.f32.mrf.mxu1 }
 0x154   :  { %v547_v12 = vadd.f32 %v540_v10, %v470_v8  ;;  %v2197_v8 = vld [vmem:[#allocation7 + $0x434] ss:$8 sps:$4 sm:$0xff]   ;;  %v2200_v10 = vld [vmem:[#allocation7 + $0x424] ss:$8 sps:$4 sm:$0xff]  }
 0x155   :  { %v542_v14 = vpop.f32.mrf.mxu1 }
 0x156   :  { %v561_v15 = vadd.f32 %v554_v9, %v547_v12  ;;  %v548_v16 = vadd.f32 %v542_v14, %v472_v11  ;;  %v2195_v9 = vld [vmem:[#allocation7 + $0x430] ss:$8 sps:$4 sm:$0xff]   ;;  %v2198_v11 = vld [vmem:[#allocation7 + $0x420] ss:$8 sps:$4 sm:$0xff]  }
 0x157   :  { %v544_v17 = vpop.f32.mrf.mxu1  ;;  %v2201_v12 = vld [vmem:[#allocation9 + $0x78] sm:$0xff]   ;;  %v2203_v14 = vld [vmem:[#allocation9 + $0x70] sm:$0xff]  }
 0x158   :  { %v562_v18 = vadd.f32 %v558_v13, %v548_v16  ;;  %v563_v19 = vmax.f32 %v561_v15, 0.0  ;;  %v2202_v13 = vld [vmem:[#allocation9 + $0x38] sm:$0xff]   ;;  %1892 = vmatprep.subr.bf16.mxu1 %v2201_v12  ;;  %v2204_v15 = vld [vmem:[#allocation9 + $0x30] sm:$0xff]   ;;  %v2205_v16 = vld [vmem:[#allocation9 + $0x68] sm:$0xff]  }
 0x159   :  { %v545_v20 = vpop.f32.mrf.mxu1  ;;  %v2206_v17 = vld [vmem:[#allocation9 + $0x28] sm:$0xff]  }
 0x15a   :  { %v564_v21 = vmax.f32 %v562_v18, 0.0  ;;  %v565_v23 = vpack.c.bf16 %v563_v19, %v563_v19  ;;  %v850_v18 = vld [vmem:[#allocation10 + $0x2] ss:$8 sm:$0x3] }
 0x15b   :  { %v855_v19 = vrot.slane %v850_v18, %v2443_v3  ;;  %v859_v20 = vrot.slane %v850_v18, %v2445_v6  ;;  %v2219_v12 = vld [vmem:[#allocation9 + $0x88] sm:$0xff]   ;;  %v2224_v18 = vld [vmem:[#allocation9 + $0xc0] sm:$0xff]  }
 0x15c   :  { %v566_v22 = vpack.c.bf16 %v564_v21, %v564_v21 }
 0x15e   :  { %804 = vmatprep.mubr.bf16.mxu0 %v566_v22 }
 0x15f   :  { %805 = vmatmul.mubr.bf16.vlgmr.msra.gmra.mxu0 %v565_v23 }
 0x160   :  { %1273 = vmatpush1.bf16.msra.mxu0 %v2153_v28 }
 0x161   :  { %1274 = vmatprep.subr.bf16.mxu0 %v2158_v30 }
 0x164   :  { %1275 = vmatpush1.bf16.msra.mxu0 %v2156_v31  ;;  %v2207_v31 = vld [vmem:[#allocation9 + $0x60] sm:$0xff]  }
 0x165   :  { %1276 = vmatprep.subr.bf16.mxu0 %v2161_v32  ;;  %v2208_v32 = vld [vmem:[#allocation9 + $0x20] sm:$0xff]  }
 0x168   :  { %1277 = vmatpush1.bf16.msra.mxu0 %v2159_v33  ;;  %v2209_v33 = vld [vmem:[#allocation9 + $0x58] sm:$0xff]  }
 0x169   :  { %1278 = vmatprep.subr.bf16.mxu0 %v2164_v34  ;;  %v2210_v34 = vld [vmem:[#allocation9 + $0x18] sm:$0xff]  }
 0x16c   :  { %1279 = vmatpush1.bf16.msra.mxu0 %v2162_v35  ;;  %v2211_v35 = vld [vmem:[#allocation9 + $0x50] sm:$0xff]  }
 0x16d   :  { %1280 = vmatprep.subr.bf16.mxu0 %v2167_v36  ;;  %v2212_v36 = vld [vmem:[#allocation9 + $0x10] sm:$0xff]  }
 0x170   :  { %1281 = vmatpush1.bf16.msra.mxu0 %v2165_v37  ;;  %v2213_v37 = vld [vmem:[#allocation9 + $0x48] sm:$0xff]  }
 0x171   :  { %1282 = vmatprep.subr.bf16.mxu0 %v2170_v38  ;;  %v2214_v38 = vld [vmem:[#allocation9 + $0x8] sm:$0xff]  }
 0x174   :  { %1283 = vmatpush1.bf16.msra.mxu0 %v2168_v39  ;;  %v2215_v39 = vld [vmem:[#allocation9 + $0x40] sm:$0xff]  }
 0x175   :  { %1284 = vmatprep.subr.bf16.mxu0 %v2173_v40  ;;  %v2216_v40 = vld [vmem:[#allocation9] sm:$0xff]  }
 0x178   :  { %1285 = vmatpush1.bf16.msra.mxu0 %v2171_v41  ;;  %v1100_v41 = vld [vmem:[#allocation10 + $0x3] ss:$8 sm:$0x3] }
 0x179   :  { %1286 = vmatprep.subr.bf16.mxu0 %v2176_v42  ;;  %v1105_v42 = vrot.slane %v1100_v41, %v2443_v3 }
 0x17c   :  { %1287 = vmatpush1.bf16.msra.mxu0 %v2174_v43  ;;  %v1109_v43 = vrot.slane %v1100_v41, %v2445_v6 }
 0x17d   :  { %1288 = vmatprep.subr.bf16.mxu0 %v2179_v44 }
 0x180   :  { %1289 = vmatpush2.bf16.msra.mxu0 %v2177_v45 }
 0x181   :  { %1290 = vmatprep.subr.bf16.mxu0 %v2182_v46 }
 0x184   :  { %1291 = vmatpush2.bf16.msra.mxu0 %v2180_v47 }
 0x185   :  { %1292 = vmatprep.subr.bf16.mxu0 %v2185_v48 }
 0x188   :  { %1293 = vmatpush2.bf16.msra.mxu0 %v2183_v49 }
 0x189   :  { %1294 = vmatprep.subr.bf16.mxu0 %v2188_v50 }
 0x18c   :  { %1295 = vmatpush2.bf16.msra.mxu0 %v2186_v51 }
 0x18d   :  { %1296 = vmatprep.subr.bf16.mxu0 %v2191_v52 }
 0x190   :  { %1297 = vmatpush2.bf16.msra.mxu0 %v2189_v53 }
 0x191   :  { %1298 = vmatprep.subr.bf16.mxu0 %v2194_v54  ;;  %v1349_v54 = vld [vmem:[#allocation10 + $0x4] ss:$0 sm:$0xff] }
 0x194   :  { %1299 = vmatpush2.bf16.msra.mxu0 %v2192_v55 }
 0x195   :  { %1300 = vmatprep.subr.bf16.mxu0 %v2197_v8 }
 0x198   :  { %1301 = vmatpush2.bf16.msra.mxu0 %v2195_v9  ;;  %v2217_v9 = vld [vmem:[#allocation9 + $0x98] sm:$0xff]  }
 0x199   :  { %1302 = vmatprep.subr.bf16.mxu0 %v2200_v10  ;;  %v2378_v10 = vmov 0.0  }
 0x19c   :  { %1303 = vmatpush2.bf16.msra.mxu0 %v2198_v11  ;;  %v2218_v11 = vld [vmem:[#allocation9 + $0x90] sm:$0xff]  }
 0x19d   :  { %1940 = vmatprep.subr.bf16.mxu0 %v2378_v10 }
 0x21f   :  { %v806_v59 = vpop.f32.mrf.mxu0 }
 0x220   :  { %v807_v60 = vadd.f32 %v806_v59, %v605_v57 }
 0x221   :  { %v808_v61 = vpop.f32.mrf.mxu0 }
 0x222   :  { %v809_v62 = vadd.f32 %v808_v61, %v609_v58  ;;  %v813_v63 = vmax.f32 %v807_v60, 0.0 }
 0x223   :  { %v810_v1 = vpop.f32.mrf.mxu0 }
 0x224   :  { %v814_v2 = vmax.f32 %v809_v62, 0.0  ;;  %v815_v7 = vpack.c.bf16 %v813_v63, %v813_v63 }
 0x225   :  { %v811_v4 = vpop.f32.mrf.mxu0 }
 0x226   :  { %v816_v5 = vpack.c.bf16 %v814_v2, %v814_v2  ;;  %v2376_v2 = vmov 2   ;;  %v2377_v4 = vmov 1  }
 0x227   :  { %1977 = vset.pattern.permute.xlu0 %v2376_v2  ;;  %1975 = vset.pattern.permute.xlu1 %v2377_v4 }
 0x228   :  { %1054 = vmatprep.mubr.bf16.mxu1 %v816_v5 }
 0x229   :  { %1055 = vmatmul.mubr.bf16.vlgmr.msra.gmra.mxu1 %v815_v7 }
 0x22a   :  { %1893 = vmatpush3.bf16.msra.mxu1 %v2202_v13  ;;  %v2220_v13 = vld [vmem:[#allocation9 + $0x80] sm:$0xff]  }
 0x22b   :  { %1894 = vmatprep.subr.bf16.mxu1 %v2203_v14  ;;  %v2221_v14 = vld [vmem:[#allocation9 + $0xd8] sm:$0xff]  }
 0x22e   :  { %1895 = vmatpush3.bf16.msra.mxu1 %v2204_v15  ;;  %v2222_v15 = vld [vmem:[#allocation9 + $0xd0] sm:$0xff]  }
 0x22f   :  { %1896 = vmatprep.subr.bf16.mxu1 %v2205_v16 }
 0x232   :  { %1897 = vmatpush3.bf16.msra.mxu1 %v2206_v17 }
 0x233   :  { %1898 = vmatprep.subr.bf16.mxu1 %v2207_v31  ;;  %v1529_v31 = vld [vmem:[#allocation10 + $0x5] ss:$0 sm:$0xff] }
 0x236   :  { %1899 = vmatpush3.bf16.msra.mxu1 %v2208_v32 }
 0x237   :  { %1900 = vmatprep.subr.bf16.mxu1 %v2209_v33 }
 0x23a   :  { %1901 = vmatpush3.bf16.msra.mxu1 %v2210_v34 }
 0x23b   :  { %1902 = vmatprep.subr.bf16.mxu1 %v2211_v35 }
 0x23e   :  { %1903 = vmatpush3.bf16.msra.mxu1 %v2212_v36 }
 0x23f   :  { %1904 = vmatprep.subr.bf16.mxu1 %v2213_v37 }
 0x242   :  { %1905 = vmatpush3.bf16.msra.mxu1 %v2214_v38 }
 0x243   :  { %1906 = vmatprep.subr.bf16.mxu1 %v2215_v39  ;;  %v1616_v39 = vld [vmem:[#allocation10 + $0x6] ss:$0 sm:$0xff] }
 0x246   :  { %1907 = vmatpush3.bf16.msra.mxu1 %v2216_v40 }
 0x247   :  { %1928 = vmatprep.subr.bf16.mxu1 %v2378_v10 }
 0x2e9   :  { %v1056_v21 = vpop.f32.mrf.mxu1 }
 0x2ea   :  { %v1057_v22 = vadd.f32 %v1056_v21, %v855_v19  ;;  %v2225_v19 = vld [vmem:[#allocation9 + $0xb8] sm:$0xff]  }
 0x2eb   :  { %v1058_v23 = vpop.f32.mrf.mxu1 }
 0x2ec   :  { %v1059_v24 = vadd.f32 %v1058_v23, %v859_v20  ;;  %v1063_v25 = vmax.f32 %v1057_v22, 0.0  ;;  %v2226_v20 = vld [vmem:[#allocation9 + $0xb0] sm:$0xff]  }
 0x2ed   :  { %v1060_v26 = vpop.f32.mrf.mxu1 }
 0x2ee   :  { %v1064_v27 = vmax.f32 %v1059_v24, 0.0  ;;  %v1065_v30 = vpack.c.bf16 %v1063_v25, %v1063_v25 }
 0x2ef   :  { %v1061_v28 = vpop.f32.mrf.mxu1 }
 0x2f0   :  { %v1066_v29 = vpack.c.bf16 %v1064_v27, %v1064_v27 }
 0x2f2   :  { %1304 = vmatprep.mubr.bf16.mxu0 %v1066_v29  ;;  %v2227_v29 = vld [vmem:[#allocation9 + $0xa8] sm:$0xff]  }
 0x2f3   :  { %1305 = vmatmul.mubr.bf16.vlgmr.msra.gmra.mxu0 %v1065_v30  ;;  %v2228_v30 = vld [vmem:[#allocation9 + $0xa0] sm:$0xff]  }
 0x2f4   :  { %1956 = vmatprep.mubr.msk.bf16.mxu0 %vm2379_vm2, %v2378_v10  ;;  %1941 = vmatpush3.bf16.msra.mxu0 %v2221_v14 }
 0x2f5   :  { %1942 = vmatprep.subr.bf16.mxu0 %v2378_v10 }
 0x2f8   :  { %1943 = vmatpush3.bf16.msra.mxu0 %v2222_v15 }
 0x2f9   :  { %1944 = vmatprep.subr.bf16.mxu0 %v2378_v10 }
 0x3b3   :  { %v1306_v44 = vpop.f32.mrf.mxu0 }
 0x3b4   :  { %v1307_v45 = vadd.f32 %v1306_v44, %v1105_v42 }
 0x3b5   :  { %v1308_v46 = vpop.f32.mrf.mxu0 }
 0x3b6   :  { %v1309_v47 = vadd.f32 %v1308_v46, %v1109_v43  ;;  %2229 = vtanh.f32 %v1307_v45 }
 0x3b7   :  { %v1310_v48 = vpop.f32.mrf.mxu0 }
 0x3b8   :  { %2231 = vtanh.f32 %v1309_v47 }
 0x3b9   :  { %v1311_v49 = vpop.f32.mrf.mxu0 }
 0x3c3   :  { %v2455_v50 = vpop.eup %2229 }
 0x3c4   :  { %v1315_v3 = vpack.c.bf16 %v2455_v50, %v2455_v50 }
 0x3c5   :  { %v2457_v51 = vpop.eup %2231 }
 0x3c6   :  { %v1316_v52 = vpack.c.bf16 %v2457_v51, %v2457_v51 }
 0x3c8   :  { %1478 = vmatprep.mubr.bf16.mxu1 %v1316_v52 }
 0x3c9   :  { %1479 = vmatmul.mubr.bf16.vlgmr.msra.gmra.mxu1 %v1315_v3 }
 0x3ca   :  { %1929 = vmatpush3.bf16.msra.mxu1 %v2217_v9  ;;  %1936 = vmatprep.mubr.msk.bf16.mxu1 %vm2379_vm2, %v2378_v10 }
 0x3cb   :  { %1930 = vmatprep.subr.bf16.mxu1 %v2378_v10 }
 0x3ce   :  { %1931 = vmatpush3.bf16.msra.mxu1 %v2218_v11 }
 0x3cf   :  { %1932 = vmatprep.subr.bf16.mxu1 %v2378_v10 }
 0x3d2   :  { %1933 = vmatpush3.bf16.msra.mxu1 %v2219_v12 }
 0x3d3   :  { %1934 = vmatprep.subr.bf16.mxu1 %v2378_v10 }
 0x3d6   :  { %1935 = vmatpush3.bf16.msra.mxu1 %v2220_v13 }
 0x489   :  { %v1908_v6 = vpop.f32.mrf.mxu1 }
 0x48b   :  { %v1909_v53 = vpop.f32.mrf.mxu1 }
 0x48c   :  { %v1910_v55 = vadd.f32 %v1909_v53, %v1908_v6 }
 0x48d   :  { %v1911_v56 = vpop.f32.mrf.mxu1 }
 0x48e   :  { %v1481_v57 = vadd.f32 %v1910_v55, %v1349_v54 }
 0x48f   :  { %v1912_v58 = vpop.f32.mrf.mxu1 }
 0x490   :  { %v1487_v59 = vsel %vm1486_vm1, %v1481_v57, -inf }
 0x491   :  { %1488 = vmax.xlane.f32.xlu0 %v1487_v59 }
 0x51a   :  { %v1489_v60 = vpop.xlane.xlu0 %1488 }
 0x51b   :  { %v1490_v61 = vsub.f32 %v1481_v57, %v1489_v60 }
 0x51d   :  { %v1491_v62 = vmul.f32 1.442695, %v1490_v61 }
 0x51f   :  { %2233 = vpow2.f32 %v1491_v62 }
 0x52c   :  { %v2234_v63 = vpop.eup %2233 }
 0x52d   :  { %v1493_v1 = vsel %vm1486_vm1, %v2234_v63, 0.0 }
 0x52e   :  { %1494 = vadd.xlane.f32.xlu0 %v1493_v1 }
 0x5b7   :  { %v1495_v5 = vpop.xlane.xlu0 %1494 }
 0x5b8   :  { %2235 = vrcp.f32 %v1495_v5 }
 0x5c5   :  { %v2236_v7 = vpop.eup %2235 }
 0x5c6   :  { %v1497_v8 = vmul.f32 %v2236_v7, %v2234_v63 }
 0x5c8   :  { %1515 = vperm.xlu0 %1977, %v1497_v8   ;;  %1505 = vperm.xlu1 %1975, %v1497_v8  }
 0x5cc   :  { %1976 = vset.pattern.permute.xlu1 %v2375_v0  ;;  %v2223_v0 = vld [vmem:[#allocation9 + $0xc8] sm:$0xff]  }
 0x5cd   :  { %1500 = vperm.xlu1 %1976, %v1497_v8   ;;  %1945 = vmatpush3.bf16.msra.mxu0 %v2223_v0 }
 0x5ce   :  { %1946 = vmatprep.subr.bf16.mxu0 %v2378_v10 }
 0x5d1   :  { %1947 = vmatpush3.bf16.msra.mxu0 %v2224_v18 }
 0x5d2   :  { %1948 = vmatprep.subr.bf16.mxu0 %v2378_v10 }
 0x5d5   :  { %1949 = vmatpush3.bf16.msra.mxu0 %v2225_v19 }
 0x5d6   :  { %1950 = vmatprep.subr.bf16.mxu0 %v2378_v10 }
 0x5d9   :  { %1951 = vmatpush3.bf16.msra.mxu0 %v2226_v20 }
 0x5da   :  { %1952 = vmatprep.subr.bf16.mxu0 %v2378_v10 }
 0x5dd   :  { %1953 = vmatpush3.bf16.msra.mxu0 %v2227_v29 }
 0x5de   :  { %1954 = vmatprep.subr.bf16.mxu0 %v2378_v10 }
 0x5e1   :  { %1955 = vmatpush3.bf16.msra.mxu0 %v2228_v30 }
 0x643   :  { %v1506_v16 = vpop.permute.xlu1 %1505  ;;  %v1516_v22 = vpop.permute.xlu0 %1515 }
 0x644   :  { %v1508_v17 = vmul.f32 %v2455_v50, %v1506_v16  ;;  %v1518_v25 = vmul.f32 %v2457_v51, %v1516_v22 }
 0x646   :  { %1510 = vrot.lane.b32.xlu1 %v1508_v17, %s2372_s0 }
 0x648   :  { %v1501_v21 = vpop.permute.xlu1 %1500 }
 0x649   :  { %v1503_v23 = vmul.f32 %v2455_v50, %v1501_v21 }
 0x6b8   :  { %v1511_v24 = vpop.permute.xlu1 %1510 }
 0x6b9   :  { %v1513_v26 = vadd.f32 %v1511_v24, %v1503_v23 }
 0x6bb   :  { %v1519_v27 = vadd.f32 %v1518_v25, %v1513_v26 }
 0x6bd   :  { %v1520_v28 = vpack.c.bf16 %v1519_v27, %v1519_v27 }
 0x6bf   :  { %1937 = vmatmul.mubr.msk.bf16.vlgmr.msra.gmra.mxu1 %vm1554_vm3, %v1520_v28 }
 0x77f   :  { %v1592_v32 = vpop.f32.mrf.mxu1 }
 0x780   :  { %v1593_v33 = vadd.f32 %v1592_v32, %v1529_v31 }
 0x781   :  { %v1938_v34 = vpop.f32.mrf.mxu1 }
 0x782   :  { %v1598_v35 = vmax.f32 %v1593_v33, 0.0 }
 0x783   :  { %v1595_v36 = vpop.f32.mrf.mxu1 }
 0x784   :  { %v1599_v37 = vpack.c.bf16 %v1598_v35, %v1598_v35 }
 0x785   :  { %v1939_v38 = vpop.f32.mrf.mxu1 }
 0x786   :  { %1957 = vmatmul.mubr.bf16.vlgmr.msra.gmra.mxu0 %v1599_v37 }
 0x846   :  { %v1699_v40 = vpop.f32.mrf.mxu0 }
 0x847   :  { %v1700_v41 = vadd.f32 %v1699_v40, %v1616_v39 }
 0x848   :  { %v1958_v42 = vpop.f32.mrf.mxu0 }
 0x849   :  { %1705 = vst [vmem:[%s2477_s6] sm:$0xf] %v1700_v41 }
 0x84a   :  { %v1702_v43 = vpop.f32.mrf.mxu0 }
 0x84c   :  { %v1959_v44 = vpop.f32.mrf.mxu0 }
 0x84d   :  { %1710 = vsyncpa [#allocation3], 1 }
 0x84e   :  { %1711 = vsyncpa [#allocation5], 1 }
 0x84f   :  { %1712 = vsyncpa [#allocation8], 1 }
 0x850   :  { %1713 = vsyncpa [#allocation11], 1 }

</bundles_post_ra>
